<compile_context>
chip_gen: v5e
topology: v5e:2x2
jax: 0.10.0
libtpu: 0.0.40
codegen_flags: <defaults>
</compile_context>

<pallas_src>
import numpy as np
import jax
import jax.numpy as jnp
from jax.experimental import pallas as pl
from jax.experimental.pallas import tpu as pltpu

LANE = 128
SUBLANE = 8


def _round_up(x, m):
    return (x + m - 1) // m * m


def _cdiv(a, b):
    return -(-a // b)


def mlp_kernel(x_ref, w1_ref, b1_ref, w2_ref, b2_ref, w3_ref, b3_ref, o_ref):
    # bf16 MXU operands, f32 accumulation; all activation math stays f32.
    x = x_ref[...].astype(jnp.bfloat16)

    # fc1 with folded activation betas -> plain sigmoid (tanh form: EUP + cheap VPU)
    h1 = jnp.dot(x, w1_ref[...], preferred_element_type=jnp.float32) + b1_ref[...]
    h1 = 0.5 * (jnp.tanh(0.5 * h1) + 1.0)

    # dropout_layer_1: eval-mode dropout is identity
    # TODO(synk): training-mode dropout (mask * 1/(1-p)) not implemented; eval semantics only.

    # fc2 with folded activation betas -> plain sigmoid
    h2 = jnp.dot(h1.astype(jnp.bfloat16), w2_ref[...],
                 preferred_element_type=jnp.float32) + b2_ref[...]
    h2 = 0.5 * (jnp.tanh(0.5 * h2) + 1.0)

    # fc3 (output columns unpadded; masked vst is fine in this mem-bound regime)
    y = jnp.dot(h2.astype(jnp.bfloat16), w3_ref[...],
                preferred_element_type=jnp.float32) + b3_ref[...]
    o_ref[...] = y.astype(o_ref.dtype)


def perceptron_or_inn_forward(x, params, *, block_b=4096):
    """x: [B, n_fc_in] float32. params: dict from init_params (folded bf16 weights)."""
    kp = params["kernel"]
    B, n_in = x.shape
    n_in_w, n1_p = kp["w1"].shape
    assert n_in == n_in_w, f"x feature dim {n_in} != weight rows {n_in_w}"
    _, n2_p = kp["w2"].shape
    _, n_out = kp["w3"].shape

    # Balanced batch tiles (padding <= 7 rows), multiple of 8 sublanes; force at
    # least 2 grid steps when possible so the "parallel" axis spans v7x's 2 TCs.
    n_steps = max(1, _cdiv(B, block_b))
    if n_steps == 1 and B >= 2 * SUBLANE:
        n_steps = 2
    bb = _round_up(_cdiv(B, n_steps), SUBLANE)
    grid = _cdiv(B, bb)

    # Constant operands: full-array blocks, block index never changes.
    # TODO(synk): pipeline_mode=pl.Buffered(1) on these would save ~0.4 MiB of
    # double-buffer VMEM; irrelevant at these hidden sizes.
    full = lambda shape: pl.BlockSpec(shape, lambda i: (0, 0))

    out = pl.pallas_call(
        mlp_kernel,
        out_shape=jax.ShapeDtypeStruct((B, n_out), jnp.float32),
        grid_spec=pltpu.PrefetchScalarGridSpec(
            num_scalar_prefetch=0,
            grid=(grid,),
            in_specs=[
                pl.BlockSpec((bb, n_in), lambda i: (i, 0)),  # x tile over batch (unpadded feats)
                full((n_in, n1_p)),    # w1 (beta-folded, col-padded, bf16)
                full((1, n1_p)),       # b1 (beta-folded, f32)
                full((n1_p, n2_p)),    # w2 (bf16)
                full((1, n2_p)),       # b2 (f32)
                full((n2_p, n_out)),   # w3 (row-padded only, bf16)
                full((1, n_out)),      # b3 (f32)
            ],
            out_specs=pl.BlockSpec((bb, n_out), lambda i: (i, 0)),
        ),
        compiler_params=pltpu.CompilerParams(
            dimension_semantics=("parallel",)),
    )(x, kp["w1"], kp["b1"], kp["w2"], kp["b2"], kp["w3"], kp["b3"])

    return out


def sample_activation_betas(key, n, b0_mean, b0_var, b1_mean, b1_var):
    """Mirror of Activation.resample(): signed-mixture Gaussian betas."""
    k_mix, k0, k1 = jax.random.split(key, 3)
    mix = jax.random.uniform(k_mix, (n,)) < 0.5
    b0_std = float(np.sqrt(b0_var))
    b1_std = float(np.sqrt(b1_var))
    n0 = jax.random.normal(k0, (n,))
    n1 = jax.random.normal(k1, (n,))
    beta_0 = jnp.where(mix, b0_mean + b0_std * n0, -b0_mean + b0_std * n0)
    beta_1 = jnp.where(mix, b1_mean + b1_std * n1, -b1_mean + b1_std * n1)
    return (beta_0.reshape(1, n).astype(jnp.float32),
            beta_1.reshape(1, n).astype(jnp.float32))


def _pad2d(a, rows, cols):
    out = jnp.zeros((rows, cols), a.dtype)
    return out.at[:a.shape[0], :a.shape[1]].set(a)


def init_params(key, n_fc_in, n_fc_1, n_fc_2, n_labels, config):
    ks = jax.random.split(key, 8)

    def linear_init(kw, kb, fan_in, fan_out):
        # nn.Linear default: U(-1/sqrt(fan_in), 1/sqrt(fan_in)); weight stored as [in, out]
        bound = 1.0 / np.sqrt(fan_in)
        w = jax.random.uniform(kw, (fan_in, fan_out), minval=-bound, maxval=bound)
        b = jax.random.uniform(kb, (1, fan_out), minval=-bound, maxval=bound)
        return w.astype(jnp.float32), b.astype(jnp.float32)

    w1, b1 = linear_init(ks[0], ks[1], n_fc_in, n_fc_1)
    w2, b2 = linear_init(ks[2], ks[3], n_fc_1, n_fc_2)
    w3, b3 = linear_init(ks[4], ks[5], n_fc_2, n_labels)

    act = config["act_str"]
    a1_b0, a1_b1 = sample_activation_betas(
        ks[6], n_fc_1,
        config[f"{act}_beta_0_mean"], config[f"{act}_beta_0_var"],
        config[f"{act}_beta_1_mean"], config[f"{act}_beta_1_var"])
    a2_b0, a2_b1 = sample_activation_betas(
        ks[7], n_fc_2,
        config[f"{act}_beta_0_mean"], config[f"{act}_beta_0_var"],
        config[f"{act}_beta_1_mean"], config[f"{act}_beta_1_var"])

    raw = {"w1": w1, "b1": b1, "a1_b0": a1_b0, "a1_b1": a1_b1,
           "w2": w2, "b2": b2, "a2_b0": a2_b0, "a2_b1": a2_b1,
           "w3": w3, "b3": b3}

    # Fold the static activation betas into the linear layers:
    #   1/(1+exp(-b0*(xW+b)+b1)) == sigmoid(x (W*b0) + (b*b0 - b1))
    w1f, b1f = w1 * a1_b0, b1 * a1_b0 - a1_b1
    w2f, b2f = w2 * a2_b0, b2 * a2_b0 - a2_b1

    # Only the HIDDEN dims are padded to 128 lanes (x features and output labels
    # stay unpadded; those blocks use the full array dim).  Zero padding of the
    # w2/w3 rows fed by padded activation lanes (which evaluate to sigmoid(0)=0.5)
    # guarantees no leakage into real outputs.
    n1_p = _round_up(n_fc_1, LANE)
    n2_p = _round_up(n_fc_2, LANE)

    kernel = {
        "w1": _pad2d(w1f, n_fc_in, n1_p).astype(jnp.bfloat16),
        "b1": _pad2d(b1f, 1, n1_p),
        "w2": _pad2d(w2f, n1_p, n2_p).astype(jnp.bfloat16),
        "b2": _pad2d(b2f, 1, n2_p),
        "w3": _pad2d(w3, n2_p, n_labels).astype(jnp.bfloat16),
        "b3": b3,
    }
    return {"kernel": kernel, "raw": raw,
            "dims": (n_fc_in, n_fc_1, n_fc_2, n_labels)}


def reference_forward(x, raw):
    """Pure-JAX f32 reference using the UNfolded, unpadded parameters."""
    h1 = x @ raw["w1"] + raw["b1"]
    h1 = 1.0 / (1.0 + jnp.exp(-raw["a1_b0"] * h1 + raw["a1_b1"]))
    h2 = h1 @ raw["w2"] + raw["b2"]
    h2 = 1.0 / (1.0 + jnp.exp(-raw["a2_b0"] * h2 + raw["a2_b1"]))
    return h2 @ raw["w3"] + raw["b3"]


if __name__ == "__main__":
    config = {
        "act_str": "sigmoid",
        "n_fc_in": 32,
        "n_fc_1": 64,
        "n_fc_2": 32,
        "LABELS": ["a", "b", "c", "d"],
        "d_ratio_1": 0.5,
        "do_resample_act_funcs": False,
        "sigmoid_beta_0_mean": 1.0,
        "sigmoid_beta_0_var": 0.01,
        "sigmoid_beta_1_mean": 0.0,
        "sigmoid_beta_1_var": 0.01,
    }

    key = jax.random.PRNGKey(0)
    k_params, k_x = jax.random.split(key)
    params = init_params(k_params, config["n_fc_in"], config["n_fc_1"],
                         config["n_fc_2"], len(config["LABELS"]), config)

    # B=8: single grid step.  B=20: two grid steps + ragged tail block
    # (exercises the unpadded-batch boundary masking path).
    for B in (8, 20):
        x = jax.random.normal(jax.random.fold_in(k_x, B),
                              (B, config["n_fc_in"]), dtype=jnp.float32)
        out = perceptron_or_inn_forward(x, params)
        out = jax.block_until_ready(out)

        ref = reference_forward(x, params["raw"])
        # bf16 MXU operands with f32 accumulation -> relax tolerance vs f32 ref.
        np.testing.assert_allclose(np.asarray(out), np.asarray(ref),
                                   rtol=2e-2, atol=2e-2)

    print("KERNEL_OK")
</pallas_src>

<mosaic_0001>
module attributes {stable_mosaic.version = 11 : i64} {
  func.func @mlp_kernel(%arg0: i32, %arg1: memref<8x32xf32, #tpu.memory_space<vmem>>, %arg2: memref<32x128xbf16, #tpu.memory_space<vmem>>, %arg3: memref<1x128xf32, #tpu.memory_space<vmem>>, %arg4: memref<128x128xbf16, #tpu.memory_space<vmem>>, %arg5: memref<1x128xf32, #tpu.memory_space<vmem>>, %arg6: memref<128x4xbf16, #tpu.memory_space<vmem>>, %arg7: memref<1x4xf32, #tpu.memory_space<vmem>>, %arg8: memref<8x4xf32, #tpu.memory_space<vmem>>) attributes {dimension_semantics = [#tpu.dimension_semantics<parallel>], iteration_bounds = array<i64: 1>, scalar_prefetch = 0 : i64, scratch_operands = 0 : i64, tpu.core_type = #tpu.core_type<tc>, window_params = [{transform_indices = @transform_0, window_bounds = array<i64: 8, 32>}, {pipeline_mode = #tpu.pipeline_mode<synchronous>, transform_indices = @transform_1, window_bounds = array<i64: 32, 128>}, {pipeline_mode = #tpu.pipeline_mode<synchronous>, transform_indices = @transform_2, window_bounds = array<i64: 1, 128>}, {pipeline_mode = #tpu.pipeline_mode<synchronous>, transform_indices = @transform_3, window_bounds = array<i64: 128, 128>}, {pipeline_mode = #tpu.pipeline_mode<synchronous>, transform_indices = @transform_4, window_bounds = array<i64: 1, 128>}, {pipeline_mode = #tpu.pipeline_mode<synchronous>, transform_indices = @transform_5, window_bounds = array<i64: 128, 4>}, {pipeline_mode = #tpu.pipeline_mode<synchronous>, transform_indices = @transform_6, window_bounds = array<i64: 1, 4>}, {transform_indices = @transform_7, window_bounds = array<i64: 8, 4>}]} {
    %c0 = arith.constant 0 : index
    %c0_0 = arith.constant 0 : index
    %0 = vector.load %arg1[%c0, %c0_0] : memref<8x32xf32, #tpu.memory_space<vmem>>, vector<8x32xf32>
    %1 = arith.truncf %0 : vector<8x32xf32> to vector<8x32xbf16>
    %c0_1 = arith.constant 0 : index
    %c0_2 = arith.constant 0 : index
    %2 = vector.load %arg2[%c0_1, %c0_2] : memref<32x128xbf16, #tpu.memory_space<vmem>>, vector<32x128xbf16>
    %cst = arith.constant dense<0.000000e+00> : vector<8x128xf32>
    %3 = tpu.matmul %1, %2, %cst {dimension_numbers = #tpu.dot_dimension_numbers<[1], [0], [0], [1], [0, 0, 1, 1], [], []>} : vector<8x32xbf16>, vector<32x128xbf16>, vector<8x128xf32> -> vector<8x128xf32>
    %c0_3 = arith.constant 0 : index
    %c0_4 = arith.constant 0 : index
    %4 = vector.load %arg3[%c0_3, %c0_4] : memref<1x128xf32, #tpu.memory_space<vmem>>, vector<1x128xf32>
    %5 = vector.broadcast %4 : vector<1x128xf32> to vector<8x128xf32>
    %6 = arith.addf %3, %5 : vector<8x128xf32>
    %cst_5 = arith.constant 5.000000e-01 : f32
    %7 = vector.broadcast %cst_5 : f32 to vector<8x128xf32>
    %8 = arith.mulf %7, %6 : vector<8x128xf32>
    %9 = math.tanh %8 : vector<8x128xf32>
    %cst_6 = arith.constant 1.000000e+00 : f32
    %10 = vector.broadcast %cst_6 : f32 to vector<8x128xf32>
    %11 = arith.addf %9, %10 : vector<8x128xf32>
    %cst_7 = arith.constant 5.000000e-01 : f32
    %12 = vector.broadcast %cst_7 : f32 to vector<8x128xf32>
    %13 = arith.mulf %12, %11 : vector<8x128xf32>
    %14 = arith.truncf %13 : vector<8x128xf32> to vector<8x128xbf16>
    %c0_8 = arith.constant 0 : index
    %c0_9 = arith.constant 0 : index
    %15 = vector.load %arg4[%c0_8, %c0_9] : memref<128x128xbf16, #tpu.memory_space<vmem>>, vector<128x128xbf16>
    %cst_10 = arith.constant dense<0.000000e+00> : vector<8x128xf32>
    %16 = tpu.matmul %14, %15, %cst_10 {dimension_numbers = #tpu.dot_dimension_numbers<[1], [0], [0], [1], [0, 0, 1, 1], [], []>} : vector<8x128xbf16>, vector<128x128xbf16>, vector<8x128xf32> -> vector<8x128xf32>
    %c0_11 = arith.constant 0 : index
    %c0_12 = arith.constant 0 : index
    %17 = vector.load %arg5[%c0_11, %c0_12] : memref<1x128xf32, #tpu.memory_space<vmem>>, vector<1x128xf32>
    %18 = vector.broadcast %17 : vector<1x128xf32> to vector<8x128xf32>
    %19 = arith.addf %16, %18 : vector<8x128xf32>
    %cst_13 = arith.constant 5.000000e-01 : f32
    %20 = vector.broadcast %cst_13 : f32 to vector<8x128xf32>
    %21 = arith.mulf %20, %19 : vector<8x128xf32>
    %22 = math.tanh %21 : vector<8x128xf32>
    %cst_14 = arith.constant 1.000000e+00 : f32
    %23 = vector.broadcast %cst_14 : f32 to vector<8x128xf32>
    %24 = arith.addf %22, %23 : vector<8x128xf32>
    %cst_15 = arith.constant 5.000000e-01 : f32
    %25 = vector.broadcast %cst_15 : f32 to vector<8x128xf32>
    %26 = arith.mulf %25, %24 : vector<8x128xf32>
    %27 = arith.truncf %26 : vector<8x128xf32> to vector<8x128xbf16>
    %c0_16 = arith.constant 0 : index
    %c0_17 = arith.constant 0 : index
    %28 = vector.load %arg6[%c0_16, %c0_17] : memref<128x4xbf16, #tpu.memory_space<vmem>>, vector<128x4xbf16>
    %cst_18 = arith.constant dense<0.000000e+00> : vector<8x4xf32>
    %29 = tpu.matmul %27, %28, %cst_18 {dimension_numbers = #tpu.dot_dimension_numbers<[1], [0], [0], [1], [0, 0, 1, 1], [], []>} : vector<8x128xbf16>, vector<128x4xbf16>, vector<8x4xf32> -> vector<8x4xf32>
    %c0_19 = arith.constant 0 : index
    %c0_20 = arith.constant 0 : index
    %30 = vector.load %arg7[%c0_19, %c0_20] : memref<1x4xf32, #tpu.memory_space<vmem>>, vector<1x4xf32>
    %31 = vector.broadcast %30 : vector<1x4xf32> to vector<8x4xf32>
    %32 = arith.addf %29, %31 : vector<8x4xf32>
    %c0_21 = arith.constant 0 : index
    %c0_22 = arith.constant 0 : index
    %33 = vector.load %arg8[%c0_21, %c0_22] : memref<8x4xf32, #tpu.memory_space<vmem>>, vector<8x4xf32>
    tpu.vector_store %arg8[%c0_21, %c0_22], %32 {strides = array<i32>} : memref<8x4xf32, #tpu.memory_space<vmem>>, vector<8x4xf32>,
    return
  }
  func.func @transform_0(%arg0: i32) -> (i32, i32) {
    %c0_i32 = arith.constant 0 : i32
    %c0_i32_0 = arith.constant 0 : i32
    return %arg0, %c0_i32 : i32, i32
  }
  func.func @transform_1(%arg0: i32) -> (i32, i32) {
    %c0_i32 = arith.constant 0 : i32
    %c0_i32_0 = arith.constant 0 : i32
    %c0_i32_1 = arith.constant 0 : i32
    return %c0_i32, %c0_i32_0 : i32, i32
  }
  func.func @transform_2(%arg0: i32) -> (i32, i32) {
    %c0_i32 = arith.constant 0 : i32
    %c0_i32_0 = arith.constant 0 : i32
    %c0_i32_1 = arith.constant 0 : i32
    return %c0_i32, %c0_i32_0 : i32, i32
  }
  func.func @transform_3(%arg0: i32) -> (i32, i32) {
    %c0_i32 = arith.constant 0 : i32
    %c0_i32_0 = arith.constant 0 : i32
    %c0_i32_1 = arith.constant 0 : i32
    return %c0_i32, %c0_i32_0 : i32, i32
  }
  func.func @transform_4(%arg0: i32) -> (i32, i32) {
    %c0_i32 = arith.constant 0 : i32
    %c0_i32_0 = arith.constant 0 : i32
    %c0_i32_1 = arith.constant 0 : i32
    return %c0_i32, %c0_i32_0 : i32, i32
  }
  func.func @transform_5(%arg0: i32) -> (i32, i32) {
    %c0_i32 = arith.constant 0 : i32
    %c0_i32_0 = arith.constant 0 : i32
    %c0_i32_1 = arith.constant 0 : i32
    return %c0_i32, %c0_i32_0 : i32, i32
  }
  func.func @transform_6(%arg0: i32) -> (i32, i32) {
    %c0_i32 = arith.constant 0 : i32
    %c0_i32_0 = arith.constant 0 : i32
    %c0_i32_1 = arith.constant 0 : i32
    return %c0_i32, %c0_i32_0 : i32, i32
  }
  func.func @transform_7(%arg0: i32) -> (i32, i32) {
    %c0_i32 = arith.constant 0 : i32
    %c0_i32_0 = arith.constant 0 : i32
    return %arg0, %c0_i32 : i32, i32
  }
}

</mosaic_0001>

<bundles_post_ra>
// kernel: tpu_custom_call.1
= control target key start
LH: loop header
LB: loop body
LE: loop exit
PB: predicated region body
PF: predicated region fallthrough
CT: control target
= control target key end

     0   :  { %12 = vsyncpa [#allocation3], 0  ;;  %s540_s0 = inlined_call_operand.hbm [shape: f32[8,32], index: 0, kind: input, shape index: {}]   ;;  %s541_s1 = inlined_call_operand.hbm [shape: bf16[32,128], index: 1, kind: input, shape index: {}]   ;;  %s542_s2 = inlined_call_operand.vmem [shape: f32[1,128], index: 2, kind: input, shape index: {}]   ;;  %s543_s3 = inlined_call_operand.vmem [shape: bf16[128,128], index: 3, kind: input, shape index: {}]   ;;  %s544_s4 = inlined_call_operand.vmem [shape: f32[1,128], index: 4, kind: input, shape index: {}]   ;;  %s545_s5 = inlined_call_operand.vmem [shape: bf16[128,4], index: 5, kind: input, shape index: {}]   ;;  %s546_s6 = inlined_call_operand.vmem [shape: f32[1,4], index: 6, kind: input, shape index: {}]   ;;  %s547_s7 = inlined_call_operand.vmem [shape: f32[8,4], index: 7, kind: output, shape index: {}]  }
   0x1   :  { %s19_s26 = sshll.u32 %s540_s0, 4  ;;  %s20_s26 = int_to_ptr.hbm [resolvable:$true] %s19_s26 }
   0x2   :  { %13 = vsyncpa [#allocation5], 0  ;;  %s430_s27 = smov [#allocation2]   ;;  %s29_s8 = sshll.u32 %s541_s1, 4  ;;  %s30_s8 = int_to_ptr.hbm [resolvable:$true] %s29_s8 }
   0x3   :  { %s21_s28 = sshll.u32 %s430_s27, 4  ;;  %s431_s9 = smov [#allocation4]   ;;  %s22_s28 = int_to_ptr.vmem [resolvable:$true] %s21_s28 }
   0x4   :  { %24 = dma.hbm_to_vmem [thread:$0]  %s20_s26, 128, %s22_s28, [#allocation3]  }
   0x5   :  { %s31_s10 = sshll.u32 %s431_s9, 4  ;;  %s432_s11 = smov 64   ;;  %s32_s10 = int_to_ptr.vmem [resolvable:$true] %s31_s10 }
   0x6   :  { %s433_s12 = smov 4  }
   0x7   :  { %37 = dma.hbm_to_vmem [thread:$0]  %s30_s8, 256, %s32_s10, [#allocation5], %s432_s11, %s432_s11, %s433_s12  }
   0x8   :  { %426 = dma.done.wait [#allocation3], 128  }
   0x9   :  { %427 = vsyncadd [#allocation3], 4294967168 }
   0xa   :  { %428 = dma.done.wait [#allocation5], 256  }
   0xb   :  { %429 = vsyncadd [#allocation5], 4294967040  ;;  %v350_v0 = vld [vmem:[#allocation4 + $0x8] sm:$0xff]  ;;  %v358_v1 = vld [vmem:[%s543_s3 + $0x38] sm:$0xff]  ;;  %vm79_vm0 = vcmask 261120   ;;  %vm268_vm1 = vcmask 31744  }
   0xc   :  { %89 = vmatpush.bf16.msra.mxu0 %v350_v0  ;;  %v349_v2 = vld [vmem:[#allocation4] sm:$0xff]  ;;  %v57_v3 = vld [vmem:[#allocation2] sm:$0xff]  ;;  %169 = vmatpush.bf16.msra.mxu1 %v358_v1  ;;  %v357_v4 = vld [vmem:[%s543_s3 + $0x30] sm:$0xff] }
   0xd   :  { %v58_v5 = vpack.c.bf16 %v57_v3, %v57_v3  ;;  %v356_v6 = vld [vmem:[%s543_s3 + $0x28] sm:$0xff]  ;;  %v355_v7 = vld [vmem:[%s543_s3 + $0x20] sm:$0xff]  ;;  %v354_v8 = vld [vmem:[%s543_s3 + $0x18] sm:$0xff] }
   0xe   :  { %v353_v9 = vld [vmem:[%s543_s3 + $0x10] sm:$0xff]  ;;  %v352_v10 = vld [vmem:[%s543_s3 + $0x8] sm:$0xff]  ;;  %v351_v11 = vld [vmem:[%s543_s3] sm:$0xff] }
   0xf   :  { %v366_v12 = vld [vmem:[%s545_s5 + $0x38] sm:$0xff]  ;;  %v365_v13 = vld [vmem:[%s545_s5 + $0x30] sm:$0xff]  ;;  %v364_v14 = vld [vmem:[%s545_s5 + $0x28] sm:$0xff] }
  0x10   :  { %90 = vmatpush.bf16.msra.mxu0 %v349_v2  ;;  %170 = vmatpush.bf16.msra.mxu1 %v357_v4  ;;  %v363_v15 = vld [vmem:[%s545_s5 + $0x20] sm:$0xff]  ;;  %v362_v25 = vld [vmem:[%s545_s5 + $0x18] sm:$0xff]  ;;  %v361_v26 = vld [vmem:[%s545_s5 + $0x10] sm:$0xff] }
  0x11   :  { %255 = vmatpush.bf16.msra.mxu2 %v366_v12  ;;  %v371_v16 = vld [vmem:[%s542_s2] ss:$0 sm:$0xff]  ;;  %v360_v27 = vld [vmem:[%s545_s5 + $0x8] sm:$0xff] }
  0x12   :  { %v359_v28 = vld [vmem:[%s545_s5] sm:$0xff] }
  0x13   :  { %284 = vmatmul.msk.bf16.vlgmr.msra.gmra.mxu0 %vm79_vm0, %v58_v5  ;;  %v372_v29 = vld [vmem:[%s544_s4] ss:$0 sm:$0xff] }
  0x14   :  { %171 = vmatpush.bf16.msra.mxu1 %v356_v6  ;;  %v373_v38 = vld [vmem:[%s546_s6] ss:$0 sm:$0xff] }
  0x15   :  { %256 = vmatpush.bf16.msra.mxu2 %v365_v13 }
  0x18   :  { %172 = vmatpush.bf16.msra.mxu1 %v355_v7 }
  0x19   :  { %257 = vmatpush.bf16.msra.mxu2 %v364_v14 }
  0x1c   :  { %173 = vmatpush.bf16.msra.mxu1 %v354_v8 }
  0x1d   :  { %258 = vmatpush.bf16.msra.mxu2 %v363_v15 }
  0x20   :  { %174 = vmatpush.bf16.msra.mxu1 %v353_v9 }
  0x21   :  { %259 = vmatpush.bf16.msra.mxu2 %v362_v25 }
  0x24   :  { %175 = vmatpush.bf16.msra.mxu1 %v352_v10 }
  0x25   :  { %260 = vmatpush.bf16.msra.mxu2 %v361_v26 }
  0x28   :  { %176 = vmatpush.bf16.msra.mxu1 %v351_v11 }
  0x29   :  { %261 = vmatpush.bf16.msra.mxu2 %v360_v27 }
  0x2d   :  { %262 = vmatpush.bf16.msra.mxu2 %v359_v28 }
  0x90   :  { %v92_v17 = vpop.f32.mrf.mxu0 }
  0x91   :  { %v93_v18 = vadd.f32 %v371_v16, %v92_v17 }
  0x93   :  { %v96_v19 = vmul.f32 0.5, %v93_v18 }
  0x95   :  { %374 = vtanh.f32 %v96_v19 }
  0x98   :  { %v94_v20 = vpop.f32.mrf.mxu0 }
  0x9b   :  { %v375_v21 = vpop.eup %374 }
  0x9c   :  { %v98_v22 = vadd.f32 1.0, %v375_v21 }
  0x9e   :  { %v99_v23 = vmul.f32 0.5, %v98_v22 }
  0xa0   :  { %v100_v24 = vpack.c.bf16 %v99_v23, %v99_v23 }
  0xa2   :  { %177 = vmatmul.bf16.vlgmr.msra.gmra.mxu1 %v100_v24 }
 0x11f   :  { %v178_v30 = vpop.f32.mrf.mxu1 }
 0x120   :  { %v179_v31 = vadd.f32 %v372_v29, %v178_v30 }
 0x122   :  { %v182_v32 = vmul.f32 0.5, %v179_v31 }
 0x124   :  { %376 = vtanh.f32 %v182_v32 }
 0x127   :  { %v180_v33 = vpop.f32.mrf.mxu1 }
 0x12a   :  { %v377_v34 = vpop.eup %376 }
 0x12b   :  { %v184_v35 = vadd.f32 1.0, %v377_v34 }
 0x12d   :  { %v185_v36 = vmul.f32 0.5, %v184_v35 }
 0x12f   :  { %v186_v37 = vpack.c.bf16 %v185_v36, %v185_v36 }
 0x131   :  { %263 = vmatmul.bf16.vlgmr.msra.gmra.mxu2 %v186_v37 }
 0x1b4   :  { %v264_v39 = vpop.f32.mrf.mxu2 }
 0x1b5   :  { %v265_v40 = vadd.f32 %v373_v38, %v264_v39 }
 0x1b7   :  { %269 = vst.msk [vmem:[%s547_s7] sm:$0xff] %vm268_vm1, %v265_v40 }
 0x1bc   :  { %v266_v41 = vpop.f32.mrf.mxu2 }
 0x1bd   :  { %274 = vsyncpa [#allocation3], 1 }
 0x1be   :  { %275 = vsyncpa [#allocation5], 1 }

</bundles_post_ra>
